<compile_context>
chip_gen: v6e
topology: v6e:2x2x1
jax: 0.10.0
libtpu: 0.0.40
codegen_flags: <defaults>
</compile_context>

<pallas_src>
import functools

import jax
import jax.numpy as jnp
from jax.experimental import pallas as pl
from jax.experimental.pallas import tpu as pltpu

LANE_MIN = 128
TARGET_TILE_BYTES = 2 * 1024 * 1024  # ~2 MiB per block (f32-equivalent)


def _focal_kernel(pred_ref, gt_ref, out_ref, *, alpha, gamma):
    # DMA'd in native dtype; compute in f32.
    p = pred_ref[...].astype(jnp.float32)
    y = gt_ref[...].astype(jnp.float32)

    is_pos = y == 1.0
    a_t = jnp.where(is_pos, jnp.float32(alpha), jnp.float32(1.0 - alpha))
    p_t = jnp.where(is_pos, p, 1.0 - p)

    # For binary targets (y in {0,1}, the same assumption the reference module's
    # `== 1` selects make) BCE with per-term log clamping at -100 collapses to a
    # single clamped log of p_t.  Saves one EUP log per element.
    bce = -jnp.maximum(jnp.log(p_t), -100.0)

    # Focal modulation (1 - p_t) ** gamma.  Integer gamma (default 2) lowers to
    # pure multiplies; a non-integer gamma falls back to the general power.
    one_m_pt = 1.0 - p_t
    g = float(gamma)
    if g == int(g):
        gi = int(g)
        if gi <= 0:
            mod = jnp.ones_like(one_m_pt)
        else:
            mod = one_m_pt
            for _ in range(gi - 1):
                mod = mod * one_m_pt
    else:
        mod = one_m_pt ** g

    out_ref[...] = (a_t * mod * bce).astype(out_ref.dtype)


def focal_loss(pred_cls, gt_cls, alpha=0.25, gamma=2):
    """Elementwise focal loss; returns an array with the shape/dtype of pred_cls."""
    orig_shape = pred_cls.shape
    out_dtype = pred_cls.dtype
    n = int(pred_cls.size)

    p = pred_cls.reshape(-1)
    y = gt_cls.reshape(-1)

    # Rare ragged case: pad the flat tail up to a lane multiple.  Common DL
    # shapes (n % 128 == 0) never hit this branch, so no extra HBM pass.
    pad = 0
    if n % LANE_MIN != 0:
        pad = LANE_MIN - n % LANE_MIN
        p = jnp.pad(p, (0, pad), constant_values=0.5)  # 0.5 is log-safe
        y = jnp.pad(y, (0, pad), constant_values=0.0)
    n_pad = n + pad

    # Lane width: widest slab that still leaves >= 16 rows (so we can form
    # >= 2 blocks of 8 rows, keeping both v7x TensorCores busy).
    lane_w = LANE_MIN
    for cand in (1024, 512, 256):
        if n_pad % cand == 0 and n_pad // cand >= 16:
            lane_w = cand
            break
    rows = n_pad // lane_w

    # Block rows: ~TARGET_TILE_BYTES per block.  2 inputs + 1 output, double
    # buffered -> <= ~12 MiB live buffers, comfortably inside every chip's
    # scoped-VMEM default (incl. v7x).  Keep >= 2 grid programs when possible
    # and round to the 8-sublane granule.
    target_rows = max(8, TARGET_TILE_BYTES // (lane_w * 4))
    if rows >= 16:
        block_rows = min(target_rows, pl.cdiv(rows, 2))
        block_rows = max(8, (block_rows // 8) * 8)
    else:
        block_rows = rows  # tiny input: single full-extent block
    grid = (pl.cdiv(rows, block_rows),)

    p2 = p.reshape(rows, lane_w)
    y2 = y.reshape(rows, lane_w)

    kernel = functools.partial(_focal_kernel, alpha=float(alpha), gamma=gamma)
    out2 = pl.pallas_call(
        kernel,
        out_shape=jax.ShapeDtypeStruct((rows, lane_w), out_dtype),
        grid_spec=pltpu.PrefetchScalarGridSpec(
            num_scalar_prefetch=0,
            grid=grid,
            in_specs=[
                pl.BlockSpec((block_rows, lane_w), lambda i: (i, 0)),
                pl.BlockSpec((block_rows, lane_w), lambda i: (i, 0)),
            ],
            out_specs=pl.BlockSpec((block_rows, lane_w), lambda i: (i, 0)),
        ),
        compiler_params=pltpu.CompilerParams(
            dimension_semantics=("parallel",),
        ),
    )(p2, y2)

    out = out2.reshape(-1)
    if pad:
        out = out[:n]
    return out.reshape(orig_shape)


def _focal_loss_ref(pred_cls, gt_cls, alpha=0.25, gamma=2):
    """Pure-JAX reference matching the PyTorch module (general two-log BCE)."""
    p = pred_cls.astype(jnp.float32)
    y = gt_cls.astype(jnp.float32)
    a_t = jnp.where(y == 1.0, alpha, 1.0 - alpha)
    p_t = jnp.where(y == 1.0, p, 1.0 - p)
    bce = -(y * jnp.maximum(jnp.log(p), -100.0)
            + (1.0 - y) * jnp.maximum(jnp.log(1.0 - p), -100.0))
    return (a_t * (1.0 - p_t) ** gamma * bce).astype(pred_cls.dtype)


if __name__ == "__main__":
    key = jax.random.PRNGKey(0)
    k1, k2 = jax.random.split(key)

    # Small per-anchor classification map: (batch=2, classes=4, 16, 16).
    shape = (2, 4, 16, 16)
    # pred_cls: probabilities in (0, 1) (nn.BCELoss expects probabilities).
    pred_cls = jax.nn.sigmoid(jax.random.normal(k1, shape, jnp.float32))
    # gt_cls: binary targets {0, 1}.
    gt_cls = (jax.random.uniform(k2, shape) > 0.7).astype(jnp.float32)

    out = focal_loss(pred_cls, gt_cls, alpha=0.25, gamma=2)
    out = jax.block_until_ready(out)

    ref = _focal_loss_ref(pred_cls, gt_cls, alpha=0.25, gamma=2)
    assert out.shape == shape
    assert out.dtype == pred_cls.dtype
    assert jnp.allclose(out, ref, atol=1e-5, rtol=1e-5), "mismatch vs reference"

    print("KERNEL_OK")
</pallas_src>

<mosaic_0001>
module attributes {stable_mosaic.version = 11 : i64} {
  func.func @_focal_kernel(%arg0: i32, %arg1: memref<8x128xf32, #tpu.memory_space<vmem>>, %arg2: memref<8x128xf32, #tpu.memory_space<vmem>>, %arg3: memref<8x128xf32, #tpu.memory_space<vmem>>) attributes {dimension_semantics = [#tpu.dimension_semantics<parallel>], iteration_bounds = array<i64: 2>, scalar_prefetch = 0 : i64, scratch_operands = 0 : i64, tpu.core_type = #tpu.core_type<tc>, window_params = [{transform_indices = @transform_0, window_bounds = array<i64: 8, 128>}, {transform_indices = @transform_1, window_bounds = array<i64: 8, 128>}, {transform_indices = @transform_2, window_bounds = array<i64: 8, 128>}]} {
    %c0 = arith.constant 0 : index
    %c0_0 = arith.constant 0 : index
    %0 = vector.load %arg1[%c0, %c0_0] : memref<8x128xf32, #tpu.memory_space<vmem>>, vector<8x128xf32>
    %c0_1 = arith.constant 0 : index
    %c0_2 = arith.constant 0 : index
    %1 = vector.load %arg2[%c0_1, %c0_2] : memref<8x128xf32, #tpu.memory_space<vmem>>, vector<8x128xf32>
    %cst = arith.constant 1.000000e+00 : f32
    %2 = vector.broadcast %cst : f32 to vector<8x128xf32>
    %3 = arith.cmpf oeq, %1, %2 : vector<8x128xf32>
    %cst_3 = arith.constant 2.500000e-01 : f32
    %cst_4 = arith.constant 7.500000e-01 : f32
    %4 = vector.broadcast %cst_3 : f32 to vector<8x128xf32>
    %5 = vector.broadcast %cst_4 : f32 to vector<8x128xf32>
    %6 = arith.select %3, %4, %5 : vector<8x128xi1>, vector<8x128xf32>
    %cst_5 = arith.constant 1.000000e+00 : f32
    %7 = vector.broadcast %cst_5 : f32 to vector<8x128xf32>
    %8 = arith.subf %7, %0 : vector<8x128xf32>
    %9 = arith.select %3, %0, %8 : vector<8x128xi1>, vector<8x128xf32>
    %10 = math.log %9 : vector<8x128xf32>
    %cst_6 = arith.constant -1.000000e+02 : f32
    %11 = vector.broadcast %cst_6 : f32 to vector<8x128xf32>
    %12 = arith.maximumf %10, %11 : vector<8x128xf32>
    %cst_7 = arith.constant 0.000000e+00 : f32
    %13 = vector.broadcast %cst_7 : f32 to vector<8x128xf32>
    %14 = arith.subf %13, %12 : vector<8x128xf32>
    %cst_8 = arith.constant 1.000000e+00 : f32
    %15 = vector.broadcast %cst_8 : f32 to vector<8x128xf32>
    %16 = arith.subf %15, %9 : vector<8x128xf32>
    %17 = arith.mulf %16, %16 : vector<8x128xf32>
    %18 = arith.mulf %6, %17 : vector<8x128xf32>
    %19 = arith.mulf %18, %14 : vector<8x128xf32>
    %c0_9 = arith.constant 0 : index
    %c0_10 = arith.constant 0 : index
    %20 = vector.load %arg3[%c0_9, %c0_10] : memref<8x128xf32, #tpu.memory_space<vmem>>, vector<8x128xf32>
    tpu.vector_store %arg3[%c0_9, %c0_10], %19 {strides = array<i32>} : memref<8x128xf32, #tpu.memory_space<vmem>>, vector<8x128xf32>,
    return
  }
  func.func @transform_0(%arg0: i32) -> (i32, i32) {
    %c0_i32 = arith.constant 0 : i32
    %c0_i32_0 = arith.constant 0 : i32
    return %arg0, %c0_i32 : i32, i32
  }
  func.func @transform_1(%arg0: i32) -> (i32, i32) {
    %c0_i32 = arith.constant 0 : i32
    %c0_i32_0 = arith.constant 0 : i32
    return %arg0, %c0_i32 : i32, i32
  }
  func.func @transform_2(%arg0: i32) -> (i32, i32) {
    %c0_i32 = arith.constant 0 : i32
    %c0_i32_0 = arith.constant 0 : i32
    return %arg0, %c0_i32 : i32, i32
  }
}

</mosaic_0001>

<bundles_post_ra>
// kernel: tpu_custom_call.1
= control target key start
LH: loop header
LB: loop body
LE: loop exit
PB: predicated region body
PF: predicated region fallthrough
CT: control target
= control target key end

     0   :  { %7 = vsyncpa [#allocation3], 0  ;;  %s731_s0 = inlined_call_operand.hbm [shape: f32[16,128], index: 0, kind: input, shape index: {}]   ;;  %s732_s1 = inlined_call_operand.hbm [shape: f32[16,128], index: 1, kind: input, shape index: {}]   ;;  %s733_s2 = inlined_call_operand.hbm [shape: f32[16,128], index: 2, kind: output, shape index: {}]  }
   0x1   :  { %9 = vsyncpa [#allocation3 + $0x1], 0 }
   0x2   :  { %10 = vsyncpa [#allocation6], 0 }
   0x3   :  { %12 = vsyncpa [#allocation6 + $0x1], 0 }
   0x4   :  { %13 = vsyncpa [#allocation4], 0 }
   0x5   :  { %15 = vsyncpa [#allocation4 + $0x1], 0  ;;  %s532_s9 = smov 0   ;;  %s534_s10 = smov 0  }
   0x6   :  { %s536_s11 = smov 0   ;;  %s538_s12 = smov 0  }
   0x7 LB: > { %s553_s13 = sadd.s32 4294967295, %s511_s12   ;;  %s318_s14 = sadd.s32 4294967294, %s511_s12   ;;  %s511_s12 = sphi %s538_s12, %s752_s12   ;;  %s507_s11 = sphi %s536_s11, %s751_s11   ;;  %s503_s10 = sphi %s534_s10, %s750_s10   ;;  %s499_s9 = sphi %s532_s9, %s749_s9  }
   0x8   : > { %s557_s15 = sadd.s32 1, %s511_s12   ;;  %s28_s16 = sadd.s32 1, %s507_s11 }
   0x9   : > { %s25_s17 = ssub.s32 %s511_s12, %s557_s15  ;;  %p35_p0 = scmp.ne.s32.totalorder %s507_s11, %s503_s10 }
   0xa   : > { %p26_p1 = scmp.eq.s32.totalorder %s25_s17, 0  ;;  %p36_p2 = scmp.eq.s32.totalorder %s511_s12, 0 }
   0xb   : > { %p41_p3 = scmp.ne.s32.totalorder %s503_s10, %s499_s9  ;;  %p42_p4 = scmp.eq.s32.totalorder %s553_s13, 0 }
   0xc   : > { %s569_s18 = scalar_select %p26_p1, %s507_s11, %s28_s16  }
   0xd   : > { %p571_p5 = por %p36_p2, %p35_p0  ;;  %p575_p6 = por %p42_p4, %p41_p3 }
   0xe   : > { %p91_p7 = scmp.eq.s32.totalorder %s553_s13, 1  ;;  %p97_p8 = scmp.eq.s32.totalorder %s318_s14, 1 }
   0xf   : > { %s737_s20 = scalar_select %p575_p6, 1, 0 }
  0x10   : > { %p350_p10 = scmp.lt.s32.totalorder %s511_s12, 2  ;;  %p582_p11 = por %p91_p7, %p35_p0 }
  0x11   : > { %p586_p12 = por %p97_p8, %p41_p3  ;;  %s591_s23 = sand.u32 1, %s507_s11  }
  0x12   : > { %s738_s21 = scalar_select %p582_p11, 1, 0 }
  0x13   : > { %s739_s22 = scalar_select %p586_p12, 1, 0 }
  0x14   : > { %s322_s24 = sshll.u32 %s511_s12, 7  ;;  %s321_s25 = sshll.u32 %s591_s23, 3 }
  0x15   : > { %s600_s28 = scalar_lea.hbm %s731_s0, %s322_s24  ;;  %s121_s29 = scalar_lea.vmem [#allocation2], %s321_s25 }
  0x16   : > { %s128_s30 = sshll.u32 %s121_s29, 4  ;;  %p606_p13 = pnand %p350_p10, %p571_p5  ;;  %s610_s30 = int_to_ptr.vmem [resolvable:$true] %s128_s30 }
  0x17   : > { %s118_s4 = scalar_lea.sflag [#allocation3], %s591_s23  ;;  %s387_s5 = scalar_lea.hbm %s600_s28, 128 }
  0x18   : > { %p388_p2 = scmp.ne.s32.totalorder %s600_s28, %s387_s5  ;;  %p389_p3 = pneg %p606_p13 }
  0x19   : > { %s392_s8 = scalar_lea.hbm %s731_s0, 256  ;;  %p393_p5 = scmp.lt.s32.totalorder %s600_s28, %s731_s0 }
  0x1a   : > { %p390_p4 = pnand %p389_p3, %p388_p2  ;;  %p394_p8 = scmp.lt.s32.totalorder %s392_s8, %s387_s5 }
  0x1c   : > { %p391_p7 = pneg %p390_p4  ;;  %p395_p10 = por %p394_p8, %p393_p5 }
  0x1e   : > { %p396_p9 = pnand %p395_p10, %p391_p7 }
  0x20   : > { %399 = shalt.err (!%p396_p9)
}
  0x21   : > { %s400_s17 = scalar_lea.vmem %s610_s30, 128  ;;  %s513_s19 = smov [#allocation2]  }
  0x22   : > { %p401_p0 = scmp.ne.s32.totalorder %s610_s30, %s400_s17  ;;  %s405_s26 = sshll.u32 %s513_s19, 4  ;;  %s406_s26 = int_to_ptr.vmem [resolvable:$false] %s405_s26 }
  0x23   : > { %s407_s27 = scalar_lea.vmem %s406_s26, 256  ;;  %p408_p1 = scmp.lt.s32.totalorder %s610_s30, %s406_s26 }
  0x24   : > { %p403_p2 = pnand %p401_p0, %p389_p3  ;;  %p409_p12 = scmp.lt.s32.totalorder %s407_s27, %s400_s17 }
  0x26   : > { %p404_p4 = pneg %p403_p2  ;;  %p410_p11 = por %p409_p12, %p408_p1 }
  0x28   : > { %p411_p5 = pnand %p410_p11, %p404_p4 }
  0x2a   : > { %414 = shalt.err (!%p411_p5)
}
  0x2b   : > { %342 = dma.hbm_to_vmem [thread:$0]  (!%p606_p13), %s600_s28, 128, %s610_s30, %s118_s4  }
  0x2c   : > { %p741_p9 = scmp.lt.s32.totalorder %s511_s12, 3  ;;  %p742_p0 = scmp.ge.s32.totalorder %s511_s12, 1 }
  0x2d   : > { %s652_s7 = scalar_lea.hbm %s732_s1, %s322_s24  ;;  %s139_s8 = scalar_lea.vmem [#allocation5], %s321_s25 }
  0x2e   : > { %p643_p7 = pnand %p742_p0, %p741_p9  ;;  %s146_s14 = sshll.u32 %s139_s8, 4  ;;  %s147_s14 = int_to_ptr.vmem [resolvable:$true] %s146_s14 }
  0x2f   : > { %s136_s28 = scalar_lea.sflag [#allocation6], %s591_s23  ;;  %s415_s30 = scalar_lea.hbm %s652_s7, 128 }
  0x30   : > { %s743_s29 = scalar_select %p643_p7, 1, 0 }
  0x31   : > { %p416_p11 = scmp.ne.s32.totalorder %s652_s7, %s415_s30  ;;  %s420_s17 = scalar_lea.hbm %s732_s1, 256 }
  0x32   : > { %p421_p8 = scmp.lt.s32.totalorder %s652_s7, %s732_s1  ;;  %p422_p10 = scmp.lt.s32.totalorder %s420_s17, %s415_s30 }
  0x33   : > { %p418_p12 = pnand %p416_p11, %p389_p3 }
  0x34   : > { %p423_p2 = por %p422_p10, %p421_p8 }
  0x35   : > { %p419_p1 = pneg %p418_p12 }
  0x37   : > { %p424_p4 = pnand %p423_p2, %p419_p1 }
  0x39   : > { %427 = shalt.err (!%p424_p4)
}
  0x3a   : > { %s428_s25 = scalar_lea.vmem %s147_s14, 128  ;;  %s514_s23 = smov [#allocation5]  }
  0x3b   : > { %p429_p5 = scmp.ne.s32.totalorder %s147_s14, %s428_s25  ;;  %s433_s26 = sshll.u32 %s514_s23, 4  ;;  %s434_s26 = int_to_ptr.vmem [resolvable:$false] %s433_s26 }
  0x3c   : > { %s435_s27 = scalar_lea.vmem %s434_s26, 256  ;;  %p436_p11 = scmp.lt.s32.totalorder %s147_s14, %s434_s26 }
  0x3d   : > { %p431_p9 = pnand %p429_p5, %p389_p3  ;;  %p437_p12 = scmp.lt.s32.totalorder %s435_s27, %s428_s25 }
  0x3f   : > { %p432_p0 = pneg %p431_p9  ;;  %p438_p6 = por %p437_p12, %p436_p11 }
  0x41   : > { %p439_p7 = pnand %p438_p6, %p432_p0 }
  0x43   : > { %442 = shalt.err (!%p439_p7)
}
  0x44   : > { %345 = dma.hbm_to_vmem [thread:$0]  (!%p606_p13), %s652_s7, 128, %s147_s14, %s136_s28  }
  0x45   : > { %p744_p1 = scmp.ne.s32.totalorder %s743_s29, 0 }
  0x46   : > { %s678_s5 = sand.u32 (!%p744_p1), 1, %s503_s10   ;;  %p745_p6 = scmp.ne.s32.totalorder (!%p744_p1), %s737_s20, 0 }
  0x47   : > { %155 = sbr.rel (%p744_p1) target bundleno = 118 (0x76), region = 28  ;;  %s681_s6 = sshll.u32 (!%p744_p1), %s678_s5, 3 }
  0x48   : > { %s158_s8 = scalar_lea.sflag (!%p744_p1), [#allocation3], %s678_s5  ;;  %s161_s30 = scalar_lea.vmem (!%p744_p1), [#allocation2], %s681_s6 }
  0x4c   : > { %486 = dma.done.wait (%p745_p6), %s158_s8, 128  }
  0x4d   : > { %488 = vsyncadd (%p745_p6), %s158_s8, 4294967168  ;;  %s167_s3 = scalar_lea.sflag [#allocation6], %s678_s5  ;;  %s170_s29 = scalar_lea.vmem [#allocation5], %s681_s6 }
  0x4e   : > { %490 = dma.done.wait (%p745_p6), %s167_s3, 128  }
  0x4f   : > { %492 = vsyncadd (%p745_p6), %s167_s3, 4294967168  ;;  %v196_v0 = vld [vmem:[%s161_s30] sm:$0xff]  ;;  %v197_v1 = vld [vmem:[%s170_s29] sm:$0xff]  ;;  %v515_v7 = vmov 0.75   ;;  %s195_s20 = scalar_lea.vmem [#allocation7], %s681_s6  ;;  %s330_s14 = sshll.u32 %s553_s13, 7 }
  0x50   : > { %vm198_vm0 = vcmp.eq.f32.partialorder %v197_v1, 1.0  ;;  %v200_v2 = vsub.f32 1.0, %v196_v0  ;;  %s225_s7 = sshll.u32 %s195_s20, 4  ;;  %s223_s16 = scalar_lea.hbm %s733_s2, %s330_s14  ;;  %s226_s7 = int_to_ptr.vmem [resolvable:$true] %s225_s7 }
  0x51   : > { %v199_v8 = vsel %vm198_vm0, 0.25, %v515_v7  ;;  %s212_s17 = scalar_lea.sflag [#allocation4], %s678_s5  ;;  %s443_s24 = scalar_lea.vmem %s226_s7, 128 }
  0x52   : > { %v201_v3 = vsel %vm198_vm0, %v196_v0, %v200_v2  ;;  %p444_p13 = scmp.ne.s32.totalorder %s226_s7, %s443_s24  ;;  %p746_p3 = scmp.ne.s32.totalorder %s738_s21, 0 }
  0x53   : > { %385 = vlog2.f32 %v201_v3  ;;  %v206_v4 = vsub.f32 1.0, %v201_v3  ;;  %s516_s19 = smov [#allocation7]  }
  0x54   : > { %p445_p7 = pnand %p444_p13, %p746_p3  ;;  %s447_s25 = sshll.u32 %s516_s19, 4  ;;  %s448_s25 = int_to_ptr.vmem [resolvable:$false] %s447_s25 }
  0x55   : > { %v207_v5 = vmul.f32 %v206_v4, %v206_v4  ;;  %s449_s23 = scalar_lea.vmem %s448_s25, 256  ;;  %p450_p10 = scmp.lt.s32.totalorder %s226_s7, %s448_s25 }
  0x56   : > { %p446_p8 = pneg %p445_p7  ;;  %p451_p2 = scmp.lt.s32.totalorder %s449_s23, %s443_s24 }
  0x57   : > { %v208_v11 = vmul.f32 %v207_v5, %v199_v8 }
  0x58   : > { %p452_p4 = por %p451_p2, %p450_p10 }
  0x5a   : > { %p453_p5 = pnand %p452_p4, %p446_p8 }
  0x60   : > { %v386_v6 = vpop.eup %385 }
  0x61   : > { %v203_v9 = vmul.f32 0.6931472, %v386_v6 }
  0x63   : > { %v204_v10 = vmax.f32 %v203_v9, -100.0 }
  0x65   : > { %v205_v12 = vsub.f32 0.0, %v204_v10 }
  0x67   : > { %v209_v13 = vmul.f32 %v208_v11, %v205_v12 }
  0x69   : > { %210 = vst [vmem:[%s195_s20] sm:$0xff] %v209_v13 }
  0x6a   : > { %456 = shalt.err (!%p453_p5)
}
  0x6b   : > { %s457_s13 = scalar_lea.hbm %s223_s16, 128  ;;  %s461_s5 = scalar_lea.hbm %s733_s2, 256 }
  0x6c   : > { %p458_p9 = scmp.ne.s32.totalorder %s223_s16, %s457_s13  ;;  %p462_p12 = scmp.lt.s32.totalorder %s223_s16, %s733_s2 }
  0x6d   : > { %p463_p1 = scmp.lt.s32.totalorder %s461_s5, %s457_s13 }
  0x6e   : > { %p459_p0 = pnand %p458_p9, %p746_p3 }
  0x6f   : > { %p464_p6 = por %p463_p1, %p462_p12 }
  0x70   : > { %p460_p11 = pneg %p459_p0 }
  0x72   : > { %p465_p13 = pnand %p464_p6, %p460_p11 }
  0x74   : > { %468 = shalt.err (!%p465_p13)
}
  0x75   : > { %337 = dma.vmem_to_hbm [thread:$0]  (%p746_p3), %s226_s7, 128, %s223_s16, %s212_s17  }
  0x76 PF: > { %s237_s30 = sand.u32 1, %s499_s9   ;;  %p747_p7 = scmp.ne.s32.totalorder %s739_s22, 0 }
  0x77   : > { %p748_p8 = scmp.ge.s32.totalorder %s511_s12, 2  ;;  %s238_s3 = scalar_lea.sflag [#allocation4], %s237_s30 }
  0x79   : > { %p347_p10 = pnand %p748_p8, %p747_p7 }
  0x7b   : > { %p348_p2 = pneg %p347_p10 }
  0x7d   : > { %494 = dma.done.wait (%p348_p2), %s238_s3, 128  }
  0x7e   : > { %496 = vsyncadd (%p348_p2), %s238_s3, 4294967168  ;;  %p18_p4 = scmp.ge.s32.totalorder %s557_s15, 4   ;;  %s749_s9 = smov %s503_s10 }
  0x7f   : > { %s750_s10 = smov %s507_s11  ;;  %s751_s11 = smov %s569_s18 }
  0x80   : > { %s752_s12 = smov %s557_s15  ;;  %20 = sbr.rel (!%p18_p4) target bundleno = 7 (0x7), region = 86 }
  0x85   :  { %243 = vsyncpa [#allocation3], 1 }
  0x86   :  { %245 = vsyncpa [#allocation3 + $0x1], 1 }
  0x87   :  { %246 = vsyncpa [#allocation6], 1 }
  0x88   :  { %248 = vsyncpa [#allocation6 + $0x1], 1 }
  0x89   :  { %249 = vsyncpa [#allocation4], 1 }
  0x8a   :  { %251 = vsyncpa [#allocation4 + $0x1], 1 }

</bundles_post_ra>
